<compile_context>
chip_gen: v7x
topology: tpu7x:2x2x1
jax: 0.10.0
libtpu: 0.0.40
codegen_flags: <defaults>
</compile_context>

<pallas_src>
import jax
import jax.numpy as jnp
from jax.experimental import pallas as pl
from jax.experimental.pallas import tpu as pltpu


# ---------------------------------------------------------------------------
# Kernel
# ---------------------------------------------------------------------------
def _stack_map_kernel(x_ref, w_ref, o_ref):
    # x_ref : (TB, sizein)   -- batch tile, full reduction dim (K = sizein)
    # w_ref : (sizein, bn)   -- packed [real | imag] columns for G maps
    # o_ref : (TB, bn)       -- lane-dense output tile (bn % 128 == 0)
    o_ref[...] = jnp.dot(
        x_ref[...], w_ref[...], preferred_element_type=jnp.float32
    ).astype(o_ref.dtype)


# ---------------------------------------------------------------------------
# One-time weight packing (keep OUTSIDE the per-call hot path!)
# ---------------------------------------------------------------------------
def pack_stack_map_weights(w_real, w_imag, *, dtype=jnp.float32):
    """Pack [num, sizein, sizeout] real/imag weights into one lane-dense slab.

    Layout: per map the columns are [real(so_pad) | imag(so_pad)], with
    so_pad = sizeout rounded up to a multiple of 64 so that 2*so_pad is a
    multiple of 128 (unmasked stores for any G).  Result: [sizein, num*2*so_pad].
    Call once and reuse; use dtype=jnp.bfloat16 to halve weight HBM traffic
    (re-validate tolerances if you do).
    """
    num, sizein, sizeout = w_real.shape
    so_pad = -(-sizeout // 64) * 64
    if so_pad != sizeout:
        pad = [(0, 0), (0, 0), (0, so_pad - sizeout)]
        w_real = jnp.pad(w_real, pad)
        w_imag = jnp.pad(w_imag, pad)
    w_pack = jnp.concatenate([w_real, w_imag], axis=-1)          # [num, sizein, 2*so_pad]
    w_pack = jnp.transpose(w_pack, (1, 0, 2)).reshape(sizein, num * 2 * so_pad)
    return w_pack.astype(dtype)


# ---------------------------------------------------------------------------
# Tiling heuristics
# ---------------------------------------------------------------------------
def _vmem_capacity_bytes():
    try:
        return int(pltpu.get_tpu_info().vmem_capacity_bytes)
    except Exception:
        return 64 * 1024 * 1024  # conservative: v7x per-TensorCore VMEM


def _vmem_footprint(tb, sizein, bn, esize, w_buffers=2):
    # Pipelined buffers: weights (w_buffers), x (2), f32 output (2).
    return (w_buffers * sizein * bn * esize
            + 2 * tb * sizein * esize
            + 2 * tb * bn * 4)


def _choose_tiling(Nb, sizein, num, so_pad, esize, budget):
    """Pick (TB, G): batch rows per step and maps per step."""
    two_so = 2 * so_pad
    TB = Nb if Nb <= 256 else 256                      # TB == Nb or a multiple of 8
    # Shrink the batch tile if even a single-map block does not fit the budget.
    while TB > 8 and _vmem_footprint(TB, sizein, two_so, esize) > budget:
        TB = max(8, TB // 2)
    nb_blocks = pl.cdiv(Nb, TB)

    divisors = [g for g in range(1, num + 1) if num % g == 0]
    fitting = [g for g in divisors
               if _vmem_footprint(TB, sizein, g * two_so, esize) <= budget]
    if not fitting:
        fitting = [1]
    # Prefer >= 2 total grid steps (v7x has 2 TensorCores), then the largest block.
    G = max(fitting, key=lambda g: ((num // g) * nb_blocks >= 2, g))
    return TB, G


# ---------------------------------------------------------------------------
# Forward
# ---------------------------------------------------------------------------
def stack_map_forward(x, w_pack, *, num, sizeout, force_pallas=False,
                      xla_fast_path_bytes=2 << 20):
    """x: [Nb, sizein] f32; w_pack: output of pack_stack_map_weights.

    Returns complex64 [Nb, num, sizeout] (== torch StackMap.forward)."""
    Nb, sizein = x.shape
    cols = w_pack.shape[1]
    assert cols % (2 * num) == 0, "w_pack not packed for this `num`"
    so_pad = cols // (2 * num)
    assert so_pad >= sizeout

    x = x.astype(w_pack.dtype)  # match compute dtype (bf16 weights => bf16 x)
    esize = jnp.dtype(w_pack.dtype).itemsize
    w_bytes = w_pack.size * esize

    if (not force_pallas) and w_bytes < xla_fast_path_bytes:
        # Tiny-weight fast path: fixed pallas_call overhead dominates; let XLA
        # fuse this dot with its neighbours instead.
        y_flat = jnp.dot(x, w_pack, preferred_element_type=jnp.float32)
    else:
        capacity = _vmem_capacity_bytes()
        budget = int(capacity * 0.70)                  # ~45 MiB on v7x, ~90 MiB on v5e/v6e
        TB, G = _choose_tiling(Nb, sizein, num, so_pad, esize, budget)
        bn = G * 2 * so_pad                            # output lanes / step (mult. of 128)
        nm_blocks = num // G
        nb_blocks = pl.cdiv(Nb, TB)

        # Deeper weight pipeline only in the weight-streaming regime and if it fits.
        w_spec_kwargs = {}
        w_buffers = 2
        if nm_blocks >= 3 and _vmem_footprint(TB, sizein, bn, esize, 3) <= budget:
            w_spec_kwargs["pipeline_mode"] = pl.Buffered(3)
            w_buffers = 3

        vmem_limit = _vmem_footprint(TB, sizein, bn, esize, w_buffers) + (2 << 20)
        vmem_limit = min(max(vmem_limit, 16 << 20), capacity)

        grid_spec = pl.GridSpec(
            # Map blocks outermost, batch blocks innermost: every weight block
            # is DMA'd from HBM exactly once; only the small x tile is re-read.
            grid=(nm_blocks, nb_blocks),
            in_specs=[
                pl.BlockSpec((TB, sizein), lambda m, b: (b, 0)),           # x tile
                pl.BlockSpec((sizein, bn), lambda m, b: (0, m),            # weight stream
                             **w_spec_kwargs),
            ],
            out_specs=pl.BlockSpec((TB, bn), lambda m, b: (b, m)),         # lane-dense out
        )

        y_flat = pl.pallas_call(
            _stack_map_kernel,
            out_shape=jax.ShapeDtypeStruct((Nb, num * 2 * so_pad), jnp.float32),
            grid_spec=grid_spec,
            compiler_params=pltpu.CompilerParams(
                dimension_semantics=("parallel", "parallel"),
                vmem_limit_bytes=int(vmem_limit),
            ),
        )(x, w_pack)

    # Contiguous reshape, drop sizeout padding, combine real/imag halves.
    y = y_flat.reshape(Nb, num, 2, so_pad)
    return jax.lax.complex(y[:, :, 0, :sizeout], y[:, :, 1, :sizeout])


def stack_map_forward_from_unpacked(x, w_real, w_imag, *, weight_dtype=jnp.float32,
                                    **kwargs):
    """Convenience one-shot path (packs weights every call — prefer caching
    pack_stack_map_weights() output for repeated use)."""
    num, _, sizeout = w_real.shape
    w_pack = pack_stack_map_weights(w_real, w_imag, dtype=weight_dtype)
    return stack_map_forward(x, w_pack, num=num, sizeout=sizeout, **kwargs)


# ---------------------------------------------------------------------------
# Demo / self-check
# ---------------------------------------------------------------------------
if __name__ == "__main__":
    Nb, num, sizein, sizeout = 2, 4, 32, 128

    key = jax.random.PRNGKey(0)
    kx, kr, ki = jax.random.split(key, 3)

    x = jax.random.normal(kx, (Nb, sizein), dtype=jnp.float32)
    w_real = jax.random.normal(kr, (num, sizein, sizeout), dtype=jnp.float32) * 0.1
    w_imag = jax.random.normal(ki, (num, sizein, sizeout), dtype=jnp.float32) * 0.1

    # Pack once (outside the per-call hot path) and reuse.
    w_pack = pack_stack_map_weights(w_real, w_imag)

    # force_pallas=True so the Pallas kernel is exercised even at demo scale
    # (the default heuristic routes <2 MiB of weights to the XLA fast path).
    y = stack_map_forward(x, w_pack, num=num, sizeout=sizeout, force_pallas=True)
    y = jax.block_until_ready(y)

    # Pure-JAX reference of StackMap.forward semantics.
    w_cplx = jax.lax.complex(w_real, w_imag)                      # [num, sizein, sizeout]
    y_ref = jnp.einsum("bi,nio->bno", x.astype(jnp.complex64), w_cplx)

    assert y.shape == (Nb, num, sizeout)
    assert y.dtype == jnp.complex64
    assert jnp.allclose(y, y_ref, atol=1e-4, rtol=1e-4)

    # The small-shape XLA fast path must agree too.
    y_fast = jax.block_until_ready(
        stack_map_forward(x, w_pack, num=num, sizeout=sizeout))
    assert jnp.allclose(y_fast, y_ref, atol=1e-4, rtol=1e-4)

    print("KERNEL_OK")
</pallas_src>

<mosaic_0001>
module attributes {stable_mosaic.version = 11 : i64} {
  func.func @_stack_map_kernel(%arg0: i32, %arg1: i32, %arg2: memref<2x32xf32, #tpu.memory_space<vmem>>, %arg3: memref<32x512xf32, #tpu.memory_space<vmem>>, %arg4: memref<2x512xf32, #tpu.memory_space<vmem>>) attributes {dimension_semantics = [#tpu.dimension_semantics<parallel>, #tpu.dimension_semantics<parallel>], iteration_bounds = array<i64: 2, 1>, scalar_prefetch = 0 : i64, scratch_operands = 0 : i64, tpu.core_type = #tpu.core_type<tc>, window_params = [{transform_indices = @transform_0, window_bounds = array<i64: 2, 32>}, {transform_indices = @transform_1, window_bounds = array<i64: 32, 512>}, {transform_indices = @transform_2, window_bounds = array<i64: 2, 512>}]} {
    %c0 = arith.constant 0 : index
    %c0_0 = arith.constant 0 : index
    %0 = vector.load %arg2[%c0, %c0_0] : memref<2x32xf32, #tpu.memory_space<vmem>>, vector<2x32xf32>
    %c0_1 = arith.constant 0 : index
    %c0_2 = arith.constant 0 : index
    %1 = vector.load %arg3[%c0_1, %c0_2] : memref<32x512xf32, #tpu.memory_space<vmem>>, vector<32x512xf32>
    %cst = arith.constant dense<0.000000e+00> : vector<2x512xf32>
    %2 = tpu.matmul %0, %1, %cst {dimension_numbers = #tpu.dot_dimension_numbers<[1], [0], [0], [1], [0, 0, 1, 1], [], []>} : vector<2x32xf32>, vector<32x512xf32>, vector<2x512xf32> -> vector<2x512xf32>
    %c0_3 = arith.constant 0 : index
    %c0_4 = arith.constant 0 : index
    %3 = vector.load %arg4[%c0_3, %c0_4] : memref<2x512xf32, #tpu.memory_space<vmem>>, vector<2x512xf32>
    tpu.vector_store %arg4[%c0_3, %c0_4], %2 {strides = array<i32>} : memref<2x512xf32, #tpu.memory_space<vmem>>, vector<2x512xf32>,
    return
  }
  func.func @transform_0(%arg0: i32, %arg1: i32) -> (i32, i32) {
    %c0_i32 = arith.constant 0 : i32
    %c0_i32_0 = arith.constant 0 : i32
    return %arg1, %c0_i32 : i32, i32
  }
  func.func @transform_1(%arg0: i32, %arg1: i32) -> (i32, i32) {
    %c0_i32 = arith.constant 0 : i32
    %c0_i32_0 = arith.constant 0 : i32
    return %c0_i32, %arg0 : i32, i32
  }
  func.func @transform_2(%arg0: i32, %arg1: i32) -> (i32, i32) {
    %c0_i32 = arith.constant 0 : i32
    return %arg1, %arg0 : i32, i32
  }
}

</mosaic_0001>

<bundles_post_ra>
// kernel: tpu_custom_call.1
= control target key start
LH: loop header
LB: loop body
LE: loop exit
PB: predicated region body
PF: predicated region fallthrough
CT: control target
= control target key end

     0   :  { %7 = vsyncpa [#allocation3], 0  ;;  %s1018_s0 = inlined_call_operand.hbm [shape: f32[2,32], index: 0, kind: input, shape index: {}]   ;;  %s1019_s1 = inlined_call_operand.hbm [shape: f32[32,1024], index: 1, kind: input, shape index: {}]   ;;  %s1020_s2 = inlined_call_operand.hbm [shape: f32[2,1024], index: 2, kind: output, shape index: {}]  }
   0x1   :  { %8 = vsyncpa [#allocation6], 0 }
   0x2   :  { %10 = vsyncpa [#allocation6 + $0x1], 0 }
   0x3   :  { %11 = vsyncpa [#allocation4], 0 }
   0x4   :  { %13 = vsyncpa [#allocation4 + $0x1], 0  ;;  %s780_s9 = smov 0   ;;  %s782_s10 = smov 0  }
   0x5   :  { %s784_s11 = smov 0   ;;  %s786_s12 = smov 0  }
   0x6   :  { %s788_s13 = smov 0   ;;  %s790_s14 = smov 0  }
   0x7 LB: > { %s496_s15 = sadd.s32 4294967295, %s755_s14   ;;  %s497_s16 = sadd.s32 4294967294, %s755_s14   ;;  %s755_s14 = sphi %s790_s14, %s19_s14   ;;  %s751_s13 = sphi %s788_s13, %s1048_s13   ;;  %s747_s12 = sphi %s786_s12, %s1047_s12   ;;  %s743_s11 = sphi %s784_s11, %s1046_s11   ;;  %s739_s10 = sphi %s782_s10, %s1045_s10   ;;  %s735_s9 = sphi %s780_s9, %s1044_s9  }
   0x8   : > { %s64_s17 = sadd.s32 1, %s743_s11  ;;  %p71_p0 = scmp.ne.s32.totalorder %s743_s11, %s739_s10 }
   0x9   : > { %p72_p1 = scmp.eq.s32.totalorder %s755_s14, 0  ;;  %p77_p2 = scmp.ne.s32.totalorder %s739_s10, %s735_s9 }
   0xa   : > { %p818_p3 = scmp.eq.s32.totalorder %s496_s15, 0  ;;  %p103_p4 = scmp.eq.s32.totalorder %s496_s15, 1 }
   0xb   : > { %p822_p5 = por %p72_p1, %p71_p0  ;;  %p109_p6 = scmp.eq.s32.totalorder %s497_s16, 1 }
   0xc   : > { %s1027_s18 = scalar_select %p818_p3, 1, 0 }
   0xd   : > { %p828_p7 = por %p818_p3, %p77_p2  ;;  %p832_p8 = por %p103_p4, %p71_p0 }
   0xe   : > { %p836_p9 = por %p109_p6, %p77_p2  ;;  %p498_p10 = scmp.ge.s32.totalorder %s755_s14, 1 }
   0xf   : > { %s1029_s20 = scalar_select %p828_p7, 1, 0 }
  0x10   : > { %s1030_s21 = scalar_select %p832_p8, 1, 0 }
  0x11   : > { %s1031_s22 = scalar_select %p836_p9, 1, 0 }
  0x12   : > { %p116_p11 = scmp.lt.s32.totalorder %s755_s14, 3  ;;  %s757_s24 = smov [#allocation2]  }
  0x13   : > { %s131_s25 = sshll.u32 %s757_s24, 4  ;;  %p554_p1 = scmp.lt.s32.totalorder %s755_s14, 2  ;;  %s132_s25 = int_to_ptr.vmem [resolvable:$true] %s131_s25 }
  0x14   : > { %p843_p13 = pnand %p498_p10, %p116_p11  ;;  %s31_s28 = sadd.s32 1, %s751_s13 }
  0x15   : > { %p852_p4 = pnand %p554_p1, %p822_p5  ;;  %p863_p6 = scmp.ge.s32.totalorder %s31_s28, 2 }
  0x16   : > { %s1032_s23 = scalar_select %p843_p13, 1, 0 }
  0x17   : > { %p541_p0 = pneg %p843_p13  ;;  %s142_s30 = sand.u32 1, %s743_s11  }
  0x18   : > { %s1033_s26 = scalar_select %p852_p4, 1, 0 }
  0x19   : > { %p858_p2 = pnand %p541_p0, %p818_p3  ;;  %s611_s5 = scalar_lea.hbm %s1018_s0, 32 }
  0x1a   : > { %s1035_s29 = scalar_select %p863_p6, 1, 0 }
  0x1b   : > { %p612_p5 = scmp.ne.s32.totalorder %s1018_s0, %s611_s5  ;;  %p613_p10 = pneg %p858_p2 }
  0x1c   : > { %p618_p0 = scmp.lt.u32.totalorder %s611_s5, %s1018_s0 }
  0x1d   : > { %p614_p11 = pnand %p613_p10, %p612_p5 }
  0x1f   : > { %p615_p1 = pneg %p614_p11 }
  0x21   : > { %p620_p12 = pnand %p618_p0, %p615_p1 }
  0x23   : > { %623 = shalt.err (!%p620_p12)
}
  0x24   : > { %s624_s16 = scalar_lea.vmem %s132_s25, 32  ;;  %p632_p3 = scmp.lt.s32.totalorder %s132_s25, %s132_s25 }
  0x25   : > { %p625_p9 = scmp.ne.s32.totalorder %s132_s25, %s624_s16  ;;  %p633_p13 = scmp.lt.s32.totalorder %s624_s16, %s624_s16 }
  0x27   : > { %p627_p8 = pnand %p625_p9, %p613_p10  ;;  %p634_p4 = por %p633_p13, %p632_p3 }
  0x29   : > { %p628_p7 = pneg %p627_p8 }
  0x2b   : > { %p635_p6 = pnand %p634_p4, %p628_p7 }
  0x2d   : > { %638 = shalt.err (!%p635_p6)
}
  0x2e   : > { %544 = dma.hbm_to_vmem [thread:$0]  (!%p858_p2), %s1018_s0, 32, %s132_s25, [#allocation3]  }
  0x2f   : > { %p1036_p9 = scmp.ne.s32.totalorder %s1035_s29, 0  ;;  %s501_s3 = sshll.u32 %s142_s30, 7 }
  0x30   : > { %s515_s5 = sshll.u32 %s751_s13, 9  ;;  %s146_s8 = scalar_lea.vmem [#allocation5], %s501_s3 }
  0x31   : > { %s1050_s28 = smov (%p1036_p9, %s31_s28), 0  ;;  %s894_s7 = scalar_lea.hbm %s1019_s1, %s515_s5 }
  0x32   : > { %s61_s4 = ssub.s32 %s751_s13, %s1050_s28  ;;  %s153_s15 = sshll.u32 %s146_s8, 4  ;;  %s901_s15 = int_to_ptr.vmem [resolvable:$true] %s153_s15 }
  0x33   : > { %p62_p3 = scmp.eq.s32.totalorder %s61_s4, 0  ;;  %s903_s29 = scalar_lea.sflag [#allocation6], %s142_s30 }
  0x34   : > { %s639_s16 = scalar_lea.hbm %s894_s7, 2048  ;;  %p1037_p8 = scmp.ne.s32.totalorder %s1033_s26, 0 }
  0x35   : > { %s899_s25 = scalar_select %p62_p3, %s743_s11, %s64_s17  }
  0x36   : > { %p640_p7 = scmp.ne.s32.totalorder %s894_s7, %s639_s16  ;;  %p641_p12 = pneg %p1037_p8 }
  0x37   : > { %s644_s3 = scalar_lea.hbm %s1019_s1, 4096  ;;  %p645_p2 = scmp.lt.u32.totalorder %s894_s7, %s1019_s1 }
  0x38   : > { %p642_p13 = pnand %p641_p12, %p640_p7  ;;  %p646_p6 = scmp.lt.u32.totalorder %s644_s3, %s639_s16 }
  0x39   : > { %p648_p10 = scmp.lt.u32.totalorder %s639_s16, %s894_s7 }
  0x3a   : > { %p643_p4 = pneg %p642_p13  ;;  %p647_p5 = por %p646_p6, %p645_p2 }
  0x3c   : > { %p649_p11 = por %p648_p10, %p647_p5 }
  0x3e   : > { %p650_p1 = pnand %p649_p11, %p643_p4 }
  0x40   : > { %653 = shalt.err (!%p650_p1)
}
  0x41   : > { %s654_s17 = scalar_lea.vmem %s901_s15, 2048  ;;  %s758_s30 = smov [#allocation5]  }
  0x42   : > { %p655_p0 = scmp.ne.s32.totalorder %s901_s15, %s654_s17  ;;  %s659_s27 = sshll.u32 %s758_s30, 4  ;;  %s660_s27 = int_to_ptr.vmem [resolvable:$false] %s659_s27 }
  0x43   : > { %s661_s6 = scalar_lea.vmem %s660_s27, 4096  ;;  %p662_p7 = scmp.lt.s32.totalorder %s901_s15, %s660_s27 }
  0x44   : > { %p657_p9 = pnand %p655_p0, %p641_p12  ;;  %p663_p13 = scmp.lt.s32.totalorder %s661_s6, %s654_s17 }
  0x46   : > { %p658_p3 = pneg %p657_p9  ;;  %p664_p2 = por %p663_p13, %p662_p7 }
  0x48   : > { %p665_p6 = pnand %p664_p2, %p658_p3 }
  0x4a   : > { %668 = shalt.err (!%p665_p6)
}
  0x4b   : > { %s759_s8 = smov 1024   ;;  %s760_s16 = smov 512  }
  0x4c   : > { %s761_s19 = smov 32   ;;  %p1038_p12 = scmp.ne.s32.totalorder %s1032_s23, 0 }
  0x4d   : > { %548 = dma.hbm_to_vmem [thread:$0]  (!%p1037_p8), %s894_s7, 2048, %s901_s15, %s903_s29, %s759_s8, %s760_s16, %s761_s19  }
  0x4e   : > { %165 = sbr.rel (%p1038_p12) target bundleno = 336 (0x150), region = 28  ;;  %p1039_p4 = scmp.ne.s32.totalorder (!%p1038_p12), %s1027_s18, 0 }
  0x55   : > { %722 = dma.done.wait (%p1039_p4), [#allocation3], 32  }
  0x56   : > { %724 = vsyncadd (%p1039_p4), [#allocation3], 4294967264  ;;  %s938_s24 = sand.u32 1, %s739_s10   ;;  %p1040_p8 = scmp.ne.s32.totalorder %s1029_s20, 0 }
  0x57   : > { %s506_s3 = sshll.u32 %s938_s24, 7  ;;  %s172_s4 = scalar_lea.sflag [#allocation6], %s938_s24 }
  0x58   : > { %s942_s5 = scalar_lea.vmem [#allocation5], %s506_s3 }
  0x59   : > { %726 = dma.done.wait (%p1040_p8), %s172_s4, 2048  }
  0x5a   : > { %728 = vsyncadd (%p1040_p8), %s172_s4, 4294965248  ;;  %v762_v0 = vmov 0.0   ;;  %v200_v1 = vld [vmem:[%s942_s5 + $0x8] sm:$0xff]  ;;  %v202_v3 = vld [vmem:[%s942_s5 + $0x18] sm:$0xff]  ;;  %vm215_vm0 = vcmask 261120   ;;  %v370_v28 = vlaneseq  ;;  %s507_s18 = sshll.u32 %s938_s24, 3 }
  0x5b   : > { %283 = vmatprep.mubr.f32.mxu0 %v762_v0  ;;  %354 = vmatprep.mubr.f32.mxu1 %v762_v0  ;;  %v204_v2 = vld [vmem:[%s942_s5 + $0x28] sm:$0xff]  ;;  %v206_v5 = vld [vmem:[%s942_s5 + $0x38] sm:$0xff]  ;;  %v199_v6 = vld [vmem:[%s942_s5] sm:$0xff]  ;;  %v763_v26 = vmov 1983009808   ;;  %s516_s20 = sshll.u32 %s747_s12, 7 }
  0x5c   : > { %v517_v4 = vpack.c.bf16 %v204_v2, %v200_v1  ;;  %v203_v7 = vld [vmem:[%s942_s5 + $0x20] sm:$0xff]  ;;  %v525_v8 = vpack.c.bf16 %v206_v5, %v202_v3  ;;  %v201_v10 = vld [vmem:[%s942_s5 + $0x10] sm:$0xff]  ;;  %v208_v12 = vld [vmem:[%s942_s5 + $0x48] sm:$0xff]  ;;  %v368_v27 = vunpack.c.l.s4 %v763_v26  ;;  %v371_v30 = vshrl.u32 %v370_v28, 7  ;;  %s195_s23 = scalar_lea.vmem [#allocation7], %s507_s18  ;;  %s969_s29 = scalar_lea.hbm %s1020_s2, %s516_s20 }
  0x5d   : > { %v519_v9 = vpack.c.bf16 %v203_v7, %v199_v6  ;;  %v205_v11 = vld [vmem:[%s942_s5 + $0x30] sm:$0xff]  ;;  %v212_v14 = vld [vmem:[%s942_s5 + $0x68] sm:$0xff]  ;;  %v210_v15 = vld [vmem:[%s942_s5 + $0x58] sm:$0xff]  ;;  %s401_s26 = sshll.u32 %s195_s23, 4  ;;  %s385_s17 = scalar_lea.sflag [#allocation4], %s938_s24  ;;  %s971_s26 = int_to_ptr.vmem [resolvable:$true] %s401_s26 }
  0x5e   : > { %518 = vmatprep.subr.bf16.mxu0 %v517_v4  ;;  %v527_v13 = vpack.c.bf16 %v205_v11, %v201_v10  ;;  %v214_v16 = vld [vmem:[%s942_s5 + $0x78] sm:$0xff]  ;;  %526 = vmatprep.subr.bf16.mxu1 %v525_v8  ;;  %v521_v17 = vpack.c.bf16 %v212_v14, %v208_v12  ;;  %v207_v19 = vld [vmem:[%s942_s5 + $0x40] sm:$0xff]  ;;  %v209_v21 = vld [vmem:[%s942_s5 + $0x50] sm:$0xff]  ;;  %v369_v29 = vunpack.c.0.s8 %v368_v27  ;;  %s669_s30 = scalar_lea.vmem %s971_s26, 128  ;;  %p1041_p10 = scmp.ne.s32.totalorder %s1030_s21, 0 }
  0x5f   : > { %520 = vmatpush1.bf16.msra.mxu0 %v519_v9  ;;  %v529_v18 = vpack.c.bf16 %v214_v16, %v210_v15  ;;  %v211_v20 = vld [vmem:[%s942_s5 + $0x60] sm:$0xff]  ;;  %v213_v23 = vld [vmem:[%s942_s5 + $0x70] sm:$0xff]  ;;  %v198_v25 = vld [vmem:[#allocation2] sm:$0x3]  ;;  %p670_p5 = scmp.ne.s32.totalorder %s971_s26, %s669_s30  ;;  %s764_s12 = smov [#allocation7]  }
  0x60   : > { %528 = vmatpush1.bf16.msra.mxu1 %v527_v13  ;;  %v523_v22 = vpack.c.bf16 %v211_v20, %v207_v19  ;;  %522 = vmatprep.subr.bf16.mxu0 %v521_v17  ;;  %v531_v24 = vpack.c.bf16 %v213_v23, %v209_v21  ;;  %v372_v32 = vsub.s32 %v369_v29, %v371_v30  ;;  %s673_s27 = sshll.u32 %s764_s12, 4  ;;  %s674_s27 = int_to_ptr.vmem [resolvable:$false] %s673_s27 }
  0x61   : > { %530 = vmatprep.subr.bf16.mxu1 %v529_v18  ;;  %p671_p11 = pnand %p670_p5, %p1041_p10  ;;  %s675_s6 = scalar_lea.vmem %s674_s27, 256 }
  0x62   : > { %p676_p0 = scmp.lt.s32.totalorder %s971_s26, %s674_s27  ;;  %p677_p9 = scmp.lt.s32.totalorder %s675_s6, %s669_s30 }
  0x63   : > { %524 = vmatpush1.bf16.msra.mxu0 %v523_v22  ;;  %p672_p1 = pneg %p671_p11 }
  0x64   : > { %532 = vmatpush1.bf16.msra.mxu1 %v531_v24  ;;  %p678_p3 = por %p677_p9, %p676_p0 }
  0x66   : > { %508 = vmatmul.mubr.msk.f32.vlgmr.msra.gmra.mrb[0].mxu0 %vm215_vm0, %v198_v25  ;;  %p679_p7 = pnand %p678_p3, %p672_p1 }
  0x67   : > { %509 = vmatmul.mubr.msk.f32.vlgmr.msra.gmra.mrb[0].mxu1 %vm215_vm0, %v198_v25 }
 0x139   : > { %v285_v31 = vpop.f32.mrb[0].mxu0 }
 0x13a   : > { %v356_v33 = vpop.f32.mrb[0].mxu1  ;;  %v287_v34 = vpop.f32.mrb[1].mxu0 }
 0x13b   : > { %v365_v35 = vcombine.low %v285_v31, %v287_v34  ;;  %v358_v36 = vpop.f32.mrb[1].mxu1 }
 0x13c   : > { %v366_v37 = vcombine.low %v356_v33, %v358_v36 }
 0x13d   : > { %v373_v38 = vrot.slane %v365_v35, %v372_v32 }
 0x13e   : > { %v380_v39 = vrot.slane %v366_v37, %v372_v32 }
 0x140   : > { %v381_v40 = vcombine.low %v373_v38, %v380_v39 }
 0x142   : > { %383 = vst [vmem:[%s195_s23] sm:$0xff] %v381_v40 }
 0x143   : > { %682 = shalt.err (!%p679_p7)
}
 0x144   : > { %s683_s8 = scalar_lea.hbm %s969_s29, 128  ;;  %s687_s24 = scalar_lea.hbm %s1020_s2, 256 }
 0x145   : > { %p684_p13 = scmp.ne.s32.totalorder %s969_s29, %s683_s8  ;;  %p688_p12 = scmp.lt.u32.totalorder %s969_s29, %s1020_s2 }
 0x146   : > { %p689_p4 = scmp.lt.u32.totalorder %s687_s24, %s683_s8  ;;  %p691_p5 = scmp.lt.u32.totalorder %s683_s8, %s969_s29 }
 0x147   : > { %p685_p2 = pnand %p684_p13, %p1041_p10 }
 0x148   : > { %p690_p8 = por %p689_p4, %p688_p12 }
 0x149   : > { %p686_p6 = pneg %p685_p2 }
 0x14a   : > { %p692_p11 = por %p691_p5, %p690_p8 }
 0x14c   : > { %p693_p1 = pnand %p692_p11, %p686_p6 }
 0x14e   : > { %696 = shalt.err (!%p693_p1)
}
 0x14f   : > { %539 = dma.vmem_to_hbm [thread:$0]  (%p1041_p10), %s971_s26, 128, %s969_s29, %s385_s17  }
 0x150 PF: > { %s413_s5 = sand.u32 1, %s735_s9   ;;  %p1042_p0 = scmp.ne.s32.totalorder %s1031_s22, 0 }
 0x151   : > { %p1043_p9 = scmp.ge.s32.totalorder %s755_s14, 2  ;;  %s414_s18 = scalar_lea.sflag [#allocation4], %s413_s5 }
 0x153   : > { %p550_p3 = pnand %p1043_p9, %p1042_p0 }
 0x155   : > { %730 = dma.done.wait (!%p550_p3), %s414_s18, 128  }
 0x156   : > { %732 = vsyncadd (!%p550_p3), %s414_s18, 4294967168  ;;  %s19_s14 = sadd.s32 1, %s755_s14   ;;  %s1044_s9 = smov %s739_s10 }
 0x157   : > { %p16_p7 = scmp.ge.s32.totalorder %s19_s14, 4   ;;  %s1045_s10 = smov %s743_s11 }
 0x158   : > { %s1046_s11 = smov %s899_s25  ;;  %s1047_s12 = smov %s751_s13 }
 0x159   : > { %s1048_s13 = smov %s1050_s28  ;;  %18 = sbr.rel (!%p16_p7) target bundleno = 7 (0x7), region = 79 }
 0x160   :  { %419 = vsyncpa [#allocation3], 1 }
 0x161   :  { %421 = vsyncpa [#allocation3 + $0x1], 1 }
 0x162   :  { %422 = vsyncpa [#allocation6], 1 }
 0x163   :  { %424 = vsyncpa [#allocation6 + $0x1], 1 }
 0x164   :  { %425 = vsyncpa [#allocation4], 1 }
 0x165   :  { %427 = vsyncpa [#allocation4 + $0x1], 1 }

</bundles_post_ra>
